<compile_context>
chip_gen: v5e
topology: v5e:2x2
jax: 0.10.0
libtpu: 0.0.40
codegen_flags: <defaults>
</compile_context>

<pallas_src>
import numpy as np
import jax
import jax.numpy as jnp
from jax.experimental import pallas as pl
from jax.experimental.pallas import tpu as pltpu


def _round_up(n, m):
    return ((n + m - 1) // m) * m


def rir_toeplitz_kernel(frames_ref, toe_ref, o_ref):
    """One output tile of the overlap-save convolution.

    frames_ref : (R, W) f32 VMEM -- R overlapping signal frames (row i of the
                                    tile covers output samples [i*B, i*B + B))
    toe_ref    : (W, B) f32 VMEM -- banded Toeplitz bank of normalized RIR taps
    o_ref      : (R, B) f32 VMEM -- R*B consecutive output samples
    """
    o_ref[...] = jnp.dot(frames_ref[...], toe_ref[...],
                         preferred_element_type=jnp.float32)


def _toeplitz_bank(h_norm, L, W, B):
    """T[r, t] = h_norm[t + (L-1) - r] where valid, else 0.  Shape (W, B)."""
    r = jnp.arange(W, dtype=jnp.int32)[:, None]
    t = jnp.arange(B, dtype=jnp.int32)[None, :]
    j = t + (L - 1) - r
    valid = (j >= 0) & (j < L)
    return jnp.where(valid, h_norm[jnp.clip(j, 0, L - 1)], 0.0).astype(jnp.float32)


def rir_room_size_forward(x, rir, *, out_block=256, rows_per_tile=8):
    """JAX/Pallas equivalent of RIR_RoomSize.forward for a given RIR.

    out_block     : output samples per lane row (multiple of 128; 256 aligns
                    with the v6e/v7x 256x256 MXU).
    rows_per_tile : output rows per grid step (multiple of 8 sublanes).  Bump
                    this for long signals to reach MiB-scale tiles / the HBM
                    roofline; defaults are sized for the small demo below.
    """
    # PyTorch squeezes rir, and squeezes x when ranks differ.
    x = jnp.squeeze(x).astype(jnp.float32)
    rir = jnp.squeeze(rir).astype(jnp.float32)
    assert x.ndim == 1 and rir.ndim == 1

    N = int(x.shape[0])
    L = int(rir.shape[0])
    out_len = N + L - 1

    B = int(out_block)
    R = int(rows_per_tile)
    assert B % 128 == 0 and R % 8 == 0

    W = _round_up(B + L - 1, B)                 # frame width (contraction dim)
    num_rows = -(-out_len // B)                 # ceil
    rows_pad = _round_up(num_rows, R)
    num_tiles = rows_pad // R

    # --- Wrapper-side prep (layout plumbing, not compute hoisting) ----------
    # Fold the L2 normalization into the Toeplitz weights.
    inv_norm = jax.lax.rsqrt(jnp.sum(rir * rir))
    toe = _toeplitz_bank(rir * inv_norm, L, W, B)

    # Zero-padded signal: xp[m] = x[m - (L-1)] inside range, 0 outside.
    P = rows_pad * B + W
    xp = jnp.zeros((P,), jnp.float32).at[L - 1:L - 1 + N].set(x)

    # Overlap-save frames: frames[i, r] = xp[i*B + r], built from K = W//B
    # shifted contiguous reshapes (no arbitrary gather).
    K = W // B
    cols = [xp[k * B: k * B + rows_pad * B].reshape(rows_pad, B) for k in range(K)]
    frames = jnp.concatenate(cols, axis=1)      # (rows_pad, W)

    # --- Gridded, pipelined MXU matmul --------------------------------------
    out = pl.pallas_call(
        rir_toeplitz_kernel,
        out_shape=jax.ShapeDtypeStruct((rows_pad, B), jnp.float32),
        grid_spec=pltpu.PrefetchScalarGridSpec(
            num_scalar_prefetch=0,
            grid=(num_tiles,),
            in_specs=[
                pl.BlockSpec((R, W), lambda i: (i, 0)),   # signal frames tile
                pl.BlockSpec((W, B), lambda i: (0, 0)),   # resident Toeplitz bank
            ],
            out_specs=pl.BlockSpec((R, B), lambda i: (i, 0)),
        ),
        compiler_params=pltpu.CompilerParams(
            dimension_semantics=("parallel",)),
    )(frames, toe)

    return out.reshape(-1)[:out_len]


if __name__ == "__main__":
    key = jax.random.PRNGKey(0)
    kx, kr = jax.random.split(key)

    # Small demo shapes: a (1, 8192) waveform (half a second @16 kHz, squeezed
    # to 1-D like the torch code) and a synthetic 192-tap exponentially
    # decaying room impulse response.  These give a multi-step grid
    # (several (8, 256) output tiles) while staying tiny.
    N, L = 8192, 192
    x = jax.random.normal(kx, (1, N), dtype=jnp.float32)
    decay = jnp.exp(-jnp.arange(L, dtype=jnp.float32) / 48.0)
    rir = jax.random.normal(kr, (L,), dtype=jnp.float32) * decay

    y = rir_room_size_forward(x, rir)
    y = jax.block_until_ready(y)

    # Reference: full convolution with the L2-normalized RIR (what torch does).
    x_np = np.asarray(jnp.squeeze(x), dtype=np.float64)
    r_np = np.asarray(rir, dtype=np.float64)
    r_np = r_np / np.linalg.norm(r_np)
    ref = np.convolve(x_np, r_np, mode="full")

    assert y.shape == (N + L - 1,), y.shape
    # Tolerance covers MXU matmul precision (f32 accumulate; loose enough even
    # if the backend runs reduced-precision MXU passes) while still catching
    # any structural/indexing error, which would produce O(1) mismatches.
    np.testing.assert_allclose(np.asarray(y, dtype=np.float64), ref,
                               rtol=2e-2, atol=2e-2)

    print("KERNEL_OK")
</pallas_src>

<mosaic_0001>
module attributes {stable_mosaic.version = 11 : i64} {
  func.func @rir_toeplitz_kernel(%arg0: i32, %arg1: memref<8x512xf32, #tpu.memory_space<vmem>>, %arg2: memref<512x256xf32, #tpu.memory_space<vmem>>, %arg3: memref<8x256xf32, #tpu.memory_space<vmem>>) attributes {dimension_semantics = [#tpu.dimension_semantics<parallel>], iteration_bounds = array<i64: 5>, scalar_prefetch = 0 : i64, scratch_operands = 0 : i64, tpu.core_type = #tpu.core_type<tc>, window_params = [{transform_indices = @transform_0, window_bounds = array<i64: 8, 512>}, {pipeline_mode = #tpu.pipeline_mode<synchronous>, transform_indices = @transform_1, window_bounds = array<i64: 512, 256>}, {transform_indices = @transform_2, window_bounds = array<i64: 8, 256>}]} {
    %c0 = arith.constant 0 : index
    %c0_0 = arith.constant 0 : index
    %0 = vector.load %arg1[%c0, %c0_0] : memref<8x512xf32, #tpu.memory_space<vmem>>, vector<8x512xf32>
    %c0_1 = arith.constant 0 : index
    %c0_2 = arith.constant 0 : index
    %1 = vector.load %arg2[%c0_1, %c0_2] : memref<512x256xf32, #tpu.memory_space<vmem>>, vector<512x256xf32>
    %cst = arith.constant dense<0.000000e+00> : vector<8x256xf32>
    %2 = tpu.matmul %0, %1, %cst {dimension_numbers = #tpu.dot_dimension_numbers<[1], [0], [0], [1], [0, 0, 1, 1], [], []>} : vector<8x512xf32>, vector<512x256xf32>, vector<8x256xf32> -> vector<8x256xf32>
    %c0_3 = arith.constant 0 : index
    %c0_4 = arith.constant 0 : index
    %3 = vector.load %arg3[%c0_3, %c0_4] : memref<8x256xf32, #tpu.memory_space<vmem>>, vector<8x256xf32>
    tpu.vector_store %arg3[%c0_3, %c0_4], %2 {strides = array<i32>} : memref<8x256xf32, #tpu.memory_space<vmem>>, vector<8x256xf32>,
    return
  }
  func.func @transform_0(%arg0: i32) -> (i32, i32) {
    %c0_i32 = arith.constant 0 : i32
    %c0_i32_0 = arith.constant 0 : i32
    return %arg0, %c0_i32 : i32, i32
  }
  func.func @transform_1(%arg0: i32) -> (i32, i32) {
    %c0_i32 = arith.constant 0 : i32
    %c0_i32_0 = arith.constant 0 : i32
    %c0_i32_1 = arith.constant 0 : i32
    return %c0_i32, %c0_i32_0 : i32, i32
  }
  func.func @transform_2(%arg0: i32) -> (i32, i32) {
    %c0_i32 = arith.constant 0 : i32
    %c0_i32_0 = arith.constant 0 : i32
    return %arg0, %c0_i32 : i32, i32
  }
}

</mosaic_0001>

<bundles_post_ra>
// kernel: tpu_custom_call.1
= control target key start
LH: loop header
LB: loop body
LE: loop exit
PB: predicated region body
PF: predicated region fallthrough
CT: control target
= control target key end

     0   :  { %7 = vsyncpa [#allocation3], 0  ;;  %s938_s0 = inlined_call_operand.hbm [shape: f32[40,512], index: 0, kind: input, shape index: {}]   ;;  %s939_s1 = inlined_call_operand.hbm [shape: f32[512,256], index: 1, kind: input, shape index: {}]   ;;  %s940_s2 = inlined_call_operand.hbm [shape: f32[40,256], index: 2, kind: output, shape index: {}]  }
   0x1   :  { %9 = vsyncpa [#allocation3 + $0x1], 0 }
   0x2   :  { %10 = vsyncpa [#allocation6], 0 }
   0x3   :  { %11 = vsyncpa [#allocation4], 0 }
   0x4   :  { %13 = vsyncpa [#allocation4 + $0x1], 0  ;;  %s797_s9 = smov 0   ;;  %s799_s10 = smov 0  }
   0x5   :  { %s801_s11 = smov 0   ;;  %s803_s12 = smov 0  }
   0x6 LB: > { %s108_s15 = sshll.u32 %s939_s1, 4  ;;  %s821_s16 = sadd.s32 4294967295, %s777_s12   ;;  %s777_s12 = sphi %s803_s12, %s949_s12   ;;  %s773_s11 = sphi %s801_s11, %s948_s11   ;;  %s769_s10 = sphi %s799_s10, %s947_s10   ;;  %s765_s9 = sphi %s797_s9, %s946_s9   ;;  %s109_s15 = int_to_ptr.hbm [resolvable:$true] %s108_s15 }
   0x7   : > { %p571_p0 = scmp.ge.s32.totalorder %s777_s12, 1  ;;  %p40_p1 = scmp.eq.s32.totalorder %s821_s16, 0 }
   0x8   : > { %p97_p2 = scmp.lt.s32.totalorder %s777_s12, 6  ;;  %s779_s18 = smov [#allocation5]  }
   0x9   : > { %s110_s19 = sshll.u32 %s779_s18, 4  ;;  %s780_s20 = smov 256   ;;  %s111_s19 = int_to_ptr.vmem [resolvable:$true] %s110_s19 }
   0xa   : > { %p826_p3 = pnand %p571_p0, %p97_p2  ;;  %s781_s21 = smov 16  }
   0xb   : > { %s570_s22 = sadd.s32 4294967294, %s777_s12   ;;  %s836_s23 = sadd.s32 1, %s777_s12  }
   0xc   : > { %p596_p4 = pneg %p826_p3  ;;  %s26_s24 = sadd.s32 1, %s773_s11 }
   0xd   : > { %s23_s25 = ssub.s32 %s777_s12, %s836_s23  ;;  %p33_p6 = scmp.ne.s32.totalorder %s773_s11, %s769_s10 }
   0xe   : > { %p597_p5 = pnand %p596_p4, %p40_p1  ;;  %p24_p7 = scmp.eq.s32.totalorder %s23_s25, 0 }
   0xf   : > { %p34_p8 = scmp.eq.s32.totalorder %s777_s12, 0  ;;  %p39_p9 = scmp.ne.s32.totalorder %s769_s10, %s765_s9 }
  0x10   : > { %599 = dma.hbm_to_vmem [thread:$0]  (!%p597_p5), %s109_s15, 16384, %s111_s19, [#allocation6], %s780_s20, %s780_s20, %s781_s21  }
  0x11   : > { %p84_p10 = scmp.eq.s32.totalorder %s821_s16, 4  ;;  %p852_p11 = por %p40_p1, %p39_p9 }
  0x12   : > { %s848_s26 = scalar_select %p24_p7, %s773_s11, %s26_s24  }
  0x13   : > { %p856_p12 = por %p84_p10, %p33_p6  ;;  %p90_p13 = scmp.eq.s32.totalorder %s570_s22, 4 }
  0x14   : > { %p35_p0 = por %p34_p8, %p33_p6  ;;  %s124_s29 = sand.u32 1, %s773_s11  }
  0x15   : > { %p861_p2 = por %p90_p13, %p39_p9  ;;  %p609_p4 = scmp.lt.s32.totalorder %s777_s12, 5 }
  0x16   : > { %s574_s3 = sshll.u32 %s124_s29, 5  ;;  %s586_s4 = sshll.u32 %s777_s12, 5 }
  0x17   : > { %s133_s7 = scalar_lea.hbm %s938_s0, %s586_s4  ;;  %s128_s13 = scalar_lea.vmem [#allocation2], %s574_s3 }
  0x18   : > { %s135_s8 = sshll.u32 %s133_s7, 4  ;;  %s137_s14 = sshll.u32 %s128_s13, 4  ;;  %s136_s8 = int_to_ptr.hbm [resolvable:$true] %s135_s8  ;;  %s138_s14 = int_to_ptr.vmem [resolvable:$true] %s137_s14 }
  0x19   : > { %p870_p5 = pnand %p609_p4, %p35_p0  ;;  %s125_s18 = scalar_lea.sflag [#allocation3], %s124_s29 }
  0x1a   : > { %s677_s19 = sshra.s32 %s136_s8, 4  ;;  %s684_s24 = scalar_lea.hbm %s938_s0, 160  ;;  %s678_s19 = int_to_ptr.hbm [resolvable:$true] %s677_s19 }
  0x1b   : > { %s679_s20 = scalar_lea.hbm %s678_s19, 32  ;;  %p681_p7 = pneg %p870_p5 }
  0x1c   : > { %p680_p6 = scmp.ne.s32.totalorder %s678_s19, %s679_s20  ;;  %p685_p10 = scmp.lt.s32.totalorder %s678_s19, %s938_s0 }
  0x1d   : > { %p686_p13 = scmp.lt.s32.totalorder %s684_s24, %s679_s20 }
  0x1e   : > { %p682_p8 = pnand %p681_p7, %p680_p6 }
  0x1f   : > { %p687_p0 = por %p686_p13, %p685_p10 }
  0x20   : > { %p683_p9 = pneg %p682_p8 }
  0x22   : > { %p688_p4 = pnand %p687_p0, %p683_p9 }
  0x24   : > { %691 = shalt.err (!%p688_p4)
}
  0x25   : > { %603 = dma.hbm_to_vmem [thread:$0]  (!%p870_p5), %s136_s8, 512, %s138_s14, %s125_s18  }
  0x26   : > { %146 = sbr.rel (%p826_p3) target bundleno = 251 (0xfb), region = 28  ;;  %s887_s29 = sand.u32 (!%p826_p3), 1, %s769_s10  }
  0x27   : > { %s578_s4 = sshll.u32 (!%p826_p3), %s887_s29, 5  ;;  %s149_s5 = scalar_lea.sflag (!%p826_p3), [#allocation3], %s887_s29 }
  0x28   : > { %s891_s6 = scalar_lea.vmem (!%p826_p3), [#allocation2], %s578_s4 }
  0x2b   : > { %752 = dma.done.wait (%p852_p11), %s149_s5, 512  }
  0x2c   : > { %754 = vsyncadd (%p852_p11), %s149_s5, 4294966784 }
  0x2d   : > { %756 = dma.done.wait (%p40_p1), [#allocation6], 16384  }
  0x2e   : > { %758 = vsyncadd (%p40_p1), [#allocation6], 4294950912  ;;  %v277_v0 = vld [vmem:[#allocation5 + $0x2f0] sm:$0xff]  ;;  %v275_v1 = vld [vmem:[#allocation5 + $0x2e0] sm:$0xff]  ;;  %s580_s17 = sshll.u32 %s887_s29, 4  ;;  %s587_s27 = sshll.u32 %s821_s16, 4 }
  0x2f   : > { %v309_v2 = vld [vmem:[#allocation5 + $0x3f0] sm:$0xff]  ;;  %351 = vmatpush.msra.mxu2 %v277_v0  ;;  %v307_v6 = vld [vmem:[#allocation5 + $0x3e0] sm:$0xff]  ;;  %v278_v62 = vld [vmem:[#allocation5 + $0x2f8] sm:$0xff]  ;;  %s178_s7 = scalar_lea.vmem [#allocation7], %s580_s17  ;;  %s485_s14 = scalar_lea.hbm %s940_s2, %s587_s27 }
  0x30   : > { %371 = vmatpush.msra.mxu3 %v309_v2  ;;  %v213_v3 = vld [vmem:[#allocation5 + $0xf0] sm:$0xff]  ;;  %v211_v7 = vld [vmem:[#allocation5 + $0xe0] sm:$0xff]  ;;  %v310_v63 = vld [vmem:[#allocation5 + $0x3f8] sm:$0xff]  ;;  %s487_s15 = sshll.u32 %s178_s7, 4  ;;  %s489_s18 = sshll.u32 %s485_s14, 4  ;;  %s488_s15 = int_to_ptr.vmem [resolvable:$true] %s487_s15  ;;  %s490_s18 = int_to_ptr.hbm [resolvable:$true] %s489_s18 }
  0x31   : > { %v245_v4 = vld [vmem:[#allocation5 + $0x1f0] sm:$0xff]  ;;  %311 = vmatpush.msra.mxu0 %v213_v3  ;;  %v243_v8 = vld [vmem:[#allocation5 + $0x1e0] sm:$0xff]  ;;  %352 = vmatpush.msra.mxu2 %v275_v1  ;;  %v276_v2 = vld [vmem:[#allocation5 + $0x2e8] sm:$0xff]  ;;  %s474_s16 = scalar_lea.sflag [#allocation4], %s887_s29  ;;  %s721_s19 = sshra.s32 %s490_s18, 4  ;;  %s722_s19 = int_to_ptr.hbm [resolvable:$true] %s721_s19 }
  0x32   : > { %v273_v5 = vld [vmem:[#allocation5 + $0x2d0] sm:$0xff]  ;;  %331 = vmatpush.msra.mxu1 %v245_v4  ;;  %372 = vmatpush.msra.mxu3 %v307_v6  ;;  %v271_v11 = vld [vmem:[#allocation5 + $0x2c0] sm:$0xff]  ;;  %v214_v3 = vld [vmem:[#allocation5 + $0xf8] sm:$0xff]  ;;  %s723_s20 = scalar_lea.hbm %s722_s19, 16  ;;  %s727_s24 = scalar_lea.hbm %s940_s2, 80 }
  0x33   : > { %v305_v9 = vld [vmem:[#allocation5 + $0x3d0] sm:$0xff]  ;;  %312 = vmatpush.msra.mxu0 %v211_v7  ;;  %v303_v13 = vld [vmem:[#allocation5 + $0x3c0] sm:$0xff]  ;;  %353 = vmatpush.msra.mxu2 %v273_v5  ;;  %v246_v4 = vld [vmem:[#allocation5 + $0x1f8] sm:$0xff]  ;;  %p724_p1 = scmp.ne.s32.totalorder %s722_s19, %s723_s20  ;;  %p728_p5 = scmp.lt.s32.totalorder %s722_s19, %s940_s2 }
  0x34   : > { %v209_v10 = vld [vmem:[#allocation5 + $0xd0] sm:$0xff]  ;;  %332 = vmatpush.msra.mxu1 %v243_v8  ;;  %373 = vmatpush.msra.mxu3 %v305_v9  ;;  %v207_v14 = vld [vmem:[#allocation5 + $0xc0] sm:$0xff]  ;;  %v308_v5 = vld [vmem:[#allocation5 + $0x3e8] sm:$0xff]  ;;  %p729_p6 = scmp.lt.s32.totalorder %s727_s24, %s723_s20 }
  0x35   : > { %v241_v12 = vld [vmem:[#allocation5 + $0x1d0] sm:$0xff]  ;;  %v239_v15 = vld [vmem:[#allocation5 + $0x1c0] sm:$0xff]  ;;  %313 = vmatpush.msra.mxu0 %v209_v10  ;;  %354 = vmatpush.msra.mxu2 %v271_v11  ;;  %v274_v6 = vld [vmem:[#allocation5 + $0x2d8] sm:$0xff]  ;;  %p725_p3 = pnand %p724_p1, %p856_p12 }
  0x36   : > { %333 = vmatpush.msra.mxu1 %v241_v12  ;;  %v269_v16 = vld [vmem:[#allocation5 + $0x2b0] sm:$0xff]  ;;  %374 = vmatpush.msra.mxu3 %v303_v13  ;;  %v267_v20 = vld [vmem:[#allocation5 + $0x2a0] sm:$0xff]  ;;  %v212_v7 = vld [vmem:[#allocation5 + $0xe8] sm:$0xff]  ;;  %p730_p7 = por %p729_p6, %p728_p5 }
  0x37   : > { %v301_v17 = vld [vmem:[#allocation5 + $0x3b0] sm:$0xff]  ;;  %314 = vmatpush.msra.mxu0 %v207_v14  ;;  %v299_v21 = vld [vmem:[#allocation5 + $0x3a0] sm:$0xff]  ;;  %355 = vmatpush.msra.mxu2 %v269_v16  ;;  %v244_v8 = vld [vmem:[#allocation5 + $0x1e8] sm:$0xff]  ;;  %p726_p11 = pneg %p725_p3 }
  0x38   : > { %v205_v18 = vld [vmem:[#allocation5 + $0xb0] sm:$0xff]  ;;  %334 = vmatpush.msra.mxu1 %v239_v15  ;;  %375 = vmatpush.msra.mxu3 %v301_v17  ;;  %v203_v22 = vld [vmem:[#allocation5 + $0xa0] sm:$0xff]  ;;  %v306_v9 = vld [vmem:[#allocation5 + $0x3d8] sm:$0xff] }
  0x39   : > { %v237_v19 = vld [vmem:[#allocation5 + $0x1b0] sm:$0xff]  ;;  %v235_v23 = vld [vmem:[#allocation5 + $0x1a0] sm:$0xff]  ;;  %315 = vmatpush.msra.mxu0 %v205_v18  ;;  %356 = vmatpush.msra.mxu2 %v267_v20  ;;  %v272_v10 = vld [vmem:[#allocation5 + $0x2c8] sm:$0xff]  ;;  %p731_p8 = pnand %p730_p7, %p726_p11 }
  0x3a   : > { %335 = vmatpush.msra.mxu1 %v237_v19  ;;  %v265_v24 = vld [vmem:[#allocation5 + $0x290] sm:$0xff]  ;;  %376 = vmatpush.msra.mxu3 %v299_v21  ;;  %v263_v28 = vld [vmem:[#allocation5 + $0x280] sm:$0xff]  ;;  %v210_v11 = vld [vmem:[#allocation5 + $0xd8] sm:$0xff] }
  0x3b   : > { %v297_v25 = vld [vmem:[#allocation5 + $0x390] sm:$0xff]  ;;  %316 = vmatpush.msra.mxu0 %v203_v22  ;;  %v295_v29 = vld [vmem:[#allocation5 + $0x380] sm:$0xff]  ;;  %357 = vmatpush.msra.mxu2 %v265_v24  ;;  %v242_v12 = vld [vmem:[#allocation5 + $0x1d8] sm:$0xff] }
  0x3c   : > { %v201_v26 = vld [vmem:[#allocation5 + $0x90] sm:$0xff]  ;;  %336 = vmatpush.msra.mxu1 %v235_v23  ;;  %377 = vmatpush.msra.mxu3 %v297_v25  ;;  %v199_v30 = vld [vmem:[#allocation5 + $0x80] sm:$0xff]  ;;  %v304_v13 = vld [vmem:[#allocation5 + $0x3c8] sm:$0xff] }
  0x3d   : > { %v233_v27 = vld [vmem:[#allocation5 + $0x190] sm:$0xff]  ;;  %v231_v31 = vld [vmem:[#allocation5 + $0x180] sm:$0xff]  ;;  %317 = vmatpush.msra.mxu0 %v201_v26  ;;  %358 = vmatpush.msra.mxu2 %v263_v28  ;;  %v270_v14 = vld [vmem:[#allocation5 + $0x2b8] sm:$0xff] }
  0x3e   : > { %337 = vmatpush.msra.mxu1 %v233_v27  ;;  %v261_v32 = vld [vmem:[#allocation5 + $0x270] sm:$0xff]  ;;  %378 = vmatpush.msra.mxu3 %v295_v29  ;;  %v259_v36 = vld [vmem:[#allocation5 + $0x260] sm:$0xff]  ;;  %v208_v15 = vld [vmem:[#allocation5 + $0xc8] sm:$0xff] }
  0x3f   : > { %v293_v33 = vld [vmem:[#allocation5 + $0x370] sm:$0xff]  ;;  %318 = vmatpush.msra.mxu0 %v199_v30  ;;  %v291_v37 = vld [vmem:[#allocation5 + $0x360] sm:$0xff]  ;;  %359 = vmatpush.msra.mxu2 %v261_v32  ;;  %v240_v16 = vld [vmem:[#allocation5 + $0x1c8] sm:$0xff] }
  0x40   : > { %v197_v34 = vld [vmem:[#allocation5 + $0x70] sm:$0xff]  ;;  %338 = vmatpush.msra.mxu1 %v231_v31  ;;  %379 = vmatpush.msra.mxu3 %v293_v33  ;;  %v195_v38 = vld [vmem:[#allocation5 + $0x60] sm:$0xff]  ;;  %v302_v17 = vld [vmem:[#allocation5 + $0x3b8] sm:$0xff] }
  0x41   : > { %v229_v35 = vld [vmem:[#allocation5 + $0x170] sm:$0xff]  ;;  %v227_v39 = vld [vmem:[#allocation5 + $0x160] sm:$0xff]  ;;  %319 = vmatpush.msra.mxu0 %v197_v34  ;;  %360 = vmatpush.msra.mxu2 %v259_v36  ;;  %v268_v18 = vld [vmem:[#allocation5 + $0x2a8] sm:$0xff] }
  0x42   : > { %339 = vmatpush.msra.mxu1 %v229_v35  ;;  %v257_v40 = vld [vmem:[#allocation5 + $0x250] sm:$0xff]  ;;  %380 = vmatpush.msra.mxu3 %v291_v37  ;;  %v255_v44 = vld [vmem:[#allocation5 + $0x240] sm:$0xff]  ;;  %v206_v19 = vld [vmem:[#allocation5 + $0xb8] sm:$0xff] }
  0x43   : > { %v289_v41 = vld [vmem:[#allocation5 + $0x350] sm:$0xff]  ;;  %320 = vmatpush.msra.mxu0 %v195_v38  ;;  %v287_v45 = vld [vmem:[#allocation5 + $0x340] sm:$0xff]  ;;  %361 = vmatpush.msra.mxu2 %v257_v40  ;;  %v238_v20 = vld [vmem:[#allocation5 + $0x1b8] sm:$0xff] }
  0x44   : > { %v193_v42 = vld [vmem:[#allocation5 + $0x50] sm:$0xff]  ;;  %340 = vmatpush.msra.mxu1 %v227_v39  ;;  %381 = vmatpush.msra.mxu3 %v289_v41  ;;  %v191_v46 = vld [vmem:[#allocation5 + $0x40] sm:$0xff]  ;;  %v300_v21 = vld [vmem:[#allocation5 + $0x3a8] sm:$0xff] }
  0x45   : > { %v225_v43 = vld [vmem:[#allocation5 + $0x150] sm:$0xff]  ;;  %v223_v47 = vld [vmem:[#allocation5 + $0x140] sm:$0xff]  ;;  %321 = vmatpush.msra.mxu0 %v193_v42  ;;  %362 = vmatpush.msra.mxu2 %v255_v44  ;;  %v266_v22 = vld [vmem:[#allocation5 + $0x298] sm:$0xff] }
  0x46   : > { %341 = vmatpush.msra.mxu1 %v225_v43  ;;  %v253_v48 = vld [vmem:[#allocation5 + $0x230] sm:$0xff]  ;;  %382 = vmatpush.msra.mxu3 %v287_v45  ;;  %v251_v52 = vld [vmem:[#allocation5 + $0x220] sm:$0xff]  ;;  %v204_v23 = vld [vmem:[#allocation5 + $0xa8] sm:$0xff] }
  0x47   : > { %v285_v49 = vld [vmem:[#allocation5 + $0x330] sm:$0xff]  ;;  %322 = vmatpush.msra.mxu0 %v191_v46  ;;  %v283_v53 = vld [vmem:[#allocation5 + $0x320] sm:$0xff]  ;;  %363 = vmatpush.msra.mxu2 %v253_v48  ;;  %v236_v24 = vld [vmem:[#allocation5 + $0x1a8] sm:$0xff] }
  0x48   : > { %v189_v50 = vld [vmem:[#allocation5 + $0x30] sm:$0xff]  ;;  %342 = vmatpush.msra.mxu1 %v223_v47  ;;  %383 = vmatpush.msra.mxu3 %v285_v49  ;;  %v187_v54 = vld [vmem:[#allocation5 + $0x20] sm:$0xff]  ;;  %v298_v25 = vld [vmem:[#allocation5 + $0x398] sm:$0xff] }
  0x49   : > { %v221_v51 = vld [vmem:[#allocation5 + $0x130] sm:$0xff]  ;;  %v219_v55 = vld [vmem:[#allocation5 + $0x120] sm:$0xff]  ;;  %323 = vmatpush.msra.mxu0 %v189_v50  ;;  %364 = vmatpush.msra.mxu2 %v251_v52  ;;  %v264_v26 = vld [vmem:[#allocation5 + $0x288] sm:$0xff] }
  0x4a   : > { %343 = vmatpush.msra.mxu1 %v221_v51  ;;  %v249_v56 = vld [vmem:[#allocation5 + $0x210] sm:$0xff]  ;;  %384 = vmatpush.msra.mxu3 %v283_v53  ;;  %v247_v60 = vld [vmem:[#allocation5 + $0x200] sm:$0xff]  ;;  %v202_v27 = vld [vmem:[#allocation5 + $0x98] sm:$0xff] }
  0x4b   : > { %v281_v57 = vld [vmem:[#allocation5 + $0x310] sm:$0xff]  ;;  %324 = vmatpush.msra.mxu0 %v187_v54  ;;  %v279_v61 = vld [vmem:[#allocation5 + $0x300] sm:$0xff]  ;;  %365 = vmatpush.msra.mxu2 %v249_v56  ;;  %v234_v28 = vld [vmem:[#allocation5 + $0x198] sm:$0xff] }
  0x4c   : > { %v185_v58 = vld [vmem:[#allocation5 + $0x10] sm:$0xff]  ;;  %344 = vmatpush.msra.mxu1 %v219_v55  ;;  %385 = vmatpush.msra.mxu3 %v281_v57  ;;  %v183_v0 = vld [vmem:[#allocation5] sm:$0xff]  ;;  %v296_v29 = vld [vmem:[#allocation5 + $0x388] sm:$0xff] }
  0x4d   : > { %v217_v59 = vld [vmem:[#allocation5 + $0x110] sm:$0xff]  ;;  %325 = vmatpush.msra.mxu0 %v185_v58  ;;  %v215_v1 = vld [vmem:[#allocation5 + $0x100] sm:$0xff]  ;;  %366 = vmatpush.msra.mxu2 %v247_v60  ;;  %v262_v30 = vld [vmem:[#allocation5 + $0x278] sm:$0xff] }
  0x4e   : > { %345 = vmatpush.msra.mxu1 %v217_v59  ;;  %386 = vmatpush.msra.mxu3 %v279_v61  ;;  %v200_v31 = vld [vmem:[#allocation5 + $0x88] sm:$0xff]  ;;  %v294_v33 = vld [vmem:[#allocation5 + $0x378] sm:$0xff]  ;;  %v181_v44 = vld [vmem:[%s891_s6 + $0x10] sm:$0xff] }
  0x4f   : > { %431 = vmatpush.msrb.mxu2 %v278_v62  ;;  %326 = vmatpush.msra.mxu0 %v183_v0  ;;  %v232_v32 = vld [vmem:[#allocation5 + $0x188] sm:$0xff]  ;;  %v198_v35 = vld [vmem:[#allocation5 + $0x78] sm:$0xff]  ;;  %v179_v53 = vld [vmem:[%s891_s6] sm:$0xff] }
  0x50   : > { %451 = vmatpush.msrb.mxu3 %v310_v63  ;;  %346 = vmatpush.msra.mxu1 %v215_v1  ;;  %v260_v34 = vld [vmem:[#allocation5 + $0x268] sm:$0xff]  ;;  %v230_v36 = vld [vmem:[#allocation5 + $0x178] sm:$0xff] }
  0x51   : > { %432 = vmatpush.msrb.mxu2 %v276_v2  ;;  %391 = vmatpush.msrb.mxu0 %v214_v3  ;;  %v292_v37 = vld [vmem:[#allocation5 + $0x368] sm:$0xff]  ;;  %v258_v38 = vld [vmem:[#allocation5 + $0x258] sm:$0xff] }
  0x52   : > { %411 = vmatpush.msrb.mxu1 %v246_v4  ;;  %452 = vmatpush.msrb.mxu3 %v308_v5  ;;  %v196_v39 = vld [vmem:[#allocation5 + $0x68] sm:$0xff]  ;;  %v290_v41 = vld [vmem:[#allocation5 + $0x358] sm:$0xff] }
  0x53   : > { %433 = vmatpush.msrb.mxu2 %v274_v6  ;;  %392 = vmatpush.msrb.mxu0 %v212_v7  ;;  %v228_v40 = vld [vmem:[#allocation5 + $0x168] sm:$0xff]  ;;  %v194_v43 = vld [vmem:[#allocation5 + $0x58] sm:$0xff] }
  0x54   : > { %412 = vmatpush.msrb.mxu1 %v244_v8  ;;  %453 = vmatpush.msrb.mxu3 %v306_v9  ;;  %v256_v42 = vld [vmem:[#allocation5 + $0x248] sm:$0xff]  ;;  %v226_v45 = vld [vmem:[#allocation5 + $0x158] sm:$0xff] }
  0x55   : > { %434 = vmatpush.msrb.mxu2 %v272_v10  ;;  %393 = vmatpush.msrb.mxu0 %v210_v11  ;;  %v254_v46 = vld [vmem:[#allocation5 + $0x238] sm:$0xff]  ;;  %v288_v47 = vld [vmem:[#allocation5 + $0x348] sm:$0xff] }
  0x56   : > { %413 = vmatpush.msrb.mxu1 %v242_v12  ;;  %454 = vmatpush.msrb.mxu3 %v304_v13  ;;  %v182_v48 = vld [vmem:[%s891_s6 + $0x18] sm:$0xff]  ;;  %v192_v49 = vld [vmem:[#allocation5 + $0x48] sm:$0xff] }
  0x57   : > { %435 = vmatpush.msrb.mxu2 %v270_v14  ;;  %394 = vmatpush.msrb.mxu0 %v208_v15  ;;  %v224_v50 = vld [vmem:[#allocation5 + $0x148] sm:$0xff]  ;;  %v286_v52 = vld [vmem:[#allocation5 + $0x338] sm:$0xff] }
  0x58   : > { %414 = vmatpush.msrb.mxu1 %v240_v16  ;;  %455 = vmatpush.msrb.mxu3 %v302_v17  ;;  %v252_v51 = vld [vmem:[#allocation5 + $0x228] sm:$0xff]  ;;  %v190_v55 = vld [vmem:[#allocation5 + $0x38] sm:$0xff] }
  0x59   : > { %436 = vmatpush.msrb.mxu2 %v268_v18  ;;  %395 = vmatpush.msrb.mxu0 %v206_v19  ;;  %v180_v54 = vld [vmem:[%s891_s6 + $0x8] sm:$0xff]  ;;  %v222_v56 = vld [vmem:[#allocation5 + $0x138] sm:$0xff] }
  0x5a   : > { %415 = vmatpush.msrb.mxu1 %v238_v20  ;;  %456 = vmatpush.msrb.mxu3 %v300_v21  ;;  %v250_v57 = vld [vmem:[#allocation5 + $0x218] sm:$0xff]  ;;  %v284_v58 = vld [vmem:[#allocation5 + $0x328] sm:$0xff] }
  0x5b   : > { %437 = vmatpush.msrb.mxu2 %v266_v22  ;;  %396 = vmatpush.msrb.mxu0 %v204_v23  ;;  %v188_v59 = vld [vmem:[#allocation5 + $0x28] sm:$0xff]  ;;  %v282_v62 = vld [vmem:[#allocation5 + $0x318] sm:$0xff] }
  0x5c   : > { %416 = vmatpush.msrb.mxu1 %v236_v24  ;;  %457 = vmatpush.msrb.mxu3 %v298_v25  ;;  %v220_v60 = vld [vmem:[#allocation5 + $0x128] sm:$0xff]  ;;  %v186_v63 = vld [vmem:[#allocation5 + $0x18] sm:$0xff] }
  0x5d   : > { %438 = vmatpush.msrb.mxu2 %v264_v26  ;;  %397 = vmatpush.msrb.mxu0 %v202_v27  ;;  %v248_v61 = vld [vmem:[#allocation5 + $0x208] sm:$0xff]  ;;  %v218_v0 = vld [vmem:[#allocation5 + $0x118] sm:$0xff] }
  0x5e   : > { %417 = vmatpush.msrb.mxu1 %v234_v28  ;;  %458 = vmatpush.msrb.mxu3 %v296_v29  ;;  %v280_v1 = vld [vmem:[#allocation5 + $0x308] sm:$0xff] }
  0x5f   : > { %439 = vmatpush.msrb.mxu2 %v262_v30  ;;  %398 = vmatpush.msrb.mxu0 %v200_v31  ;;  %v184_v2 = vld [vmem:[#allocation5 + $0x8] sm:$0xff] }
  0x60   : > { %418 = vmatpush.msrb.mxu1 %v232_v32  ;;  %459 = vmatpush.msrb.mxu3 %v294_v33  ;;  %v216_v3 = vld [vmem:[#allocation5 + $0x108] sm:$0xff] }
  0x61   : > { %440 = vmatpush.msrb.mxu2 %v260_v34  ;;  %399 = vmatpush.msrb.mxu0 %v198_v35 }
  0x62   : > { %419 = vmatpush.msrb.mxu1 %v230_v36  ;;  %460 = vmatpush.msrb.mxu3 %v292_v37 }
  0x63   : > { %441 = vmatpush.msrb.mxu2 %v258_v38  ;;  %400 = vmatpush.msrb.mxu0 %v196_v39 }
  0x64   : > { %420 = vmatpush.msrb.mxu1 %v228_v40  ;;  %461 = vmatpush.msrb.mxu3 %v290_v41 }
  0x65   : > { %442 = vmatpush.msrb.mxu2 %v256_v42  ;;  %401 = vmatpush.msrb.mxu0 %v194_v43 }
  0x66   : > { %367 = vmatmul.f32.vlgmr.msra.gmra.mxu2 %v181_v44  ;;  %421 = vmatpush.msrb.mxu1 %v226_v45 }
  0x67   : > { %443 = vmatpush.msrb.mxu2 %v254_v46  ;;  %462 = vmatpush.msrb.mxu3 %v288_v47 }
  0x68   : > { %387 = vmatmul.f32.vlgmr.msra.gmra.mxu3 %v182_v48  ;;  %402 = vmatpush.msrb.mxu0 %v192_v49 }
  0x69   : > { %422 = vmatpush.msrb.mxu1 %v224_v50  ;;  %444 = vmatpush.msrb.mxu2 %v252_v51 }
  0x6a   : > { %463 = vmatpush.msrb.mxu3 %v286_v52  ;;  %327 = vmatmul.f32.vlgmr.msra.gmra.mxu0 %v179_v53 }
  0x6b   : > { %347 = vmatmul.f32.vlgmr.msra.gmra.mxu1 %v180_v54  ;;  %403 = vmatpush.msrb.mxu0 %v190_v55 }
  0x6c   : > { %423 = vmatpush.msrb.mxu1 %v222_v56  ;;  %445 = vmatpush.msrb.mxu2 %v250_v57 }
  0x6d   : > { %464 = vmatpush.msrb.mxu3 %v284_v58  ;;  %404 = vmatpush.msrb.mxu0 %v188_v59 }
  0x6e   : > { %424 = vmatpush.msrb.mxu1 %v220_v60  ;;  %446 = vmatpush.msrb.mxu2 %v248_v61 }
  0x6f   : > { %465 = vmatpush.msrb.mxu3 %v282_v62  ;;  %447 = vmatmul.f32.vlgmr.msrb.gmra.mxu2 %v181_v44 }
  0x70   : > { %405 = vmatpush.msrb.mxu0 %v186_v63  ;;  %425 = vmatpush.msrb.mxu1 %v218_v0 }
  0x71   : > { %466 = vmatpush.msrb.mxu3 %v280_v1 }
  0x72   : > { %467 = vmatmul.f32.vlgmr.msrb.gmra.mxu3 %v182_v48  ;;  %406 = vmatpush.msrb.mxu0 %v184_v2 }
  0x73   : > { %426 = vmatpush.msrb.mxu1 %v216_v3  ;;  %407 = vmatmul.f32.vlgmr.msrb.gmra.mxu0 %v179_v53 }
  0x74   : > { %427 = vmatmul.f32.vlgmr.msrb.gmra.mxu1 %v180_v54 }
  0xe7   : > { %v328_v4 = vpop.f32.mrf.mxu0 }
  0xe8   : > { %v348_v5 = vpop.f32.mrf.mxu1 }
  0xe9   : > { %v349_v6 = vadd.f32 %v348_v5, %v328_v4  ;;  %v368_v7 = vpop.f32.mrf.mxu2 }
  0xeb   : > { %v369_v8 = vadd.f32 %v368_v7, %v349_v6  ;;  %v388_v9 = vpop.f32.mrf.mxu3 }
  0xed   : > { %v389_v10 = vadd.f32 %v388_v9, %v369_v8 }
  0xef   : > { %471 = vst [vmem:[%s178_s7] sm:$0xff] %v389_v10 }
  0xf0   : > { %v408_v11 = vpop.f32.mrf.mxu0 }
  0xf1   : > { %v428_v12 = vpop.f32.mrf.mxu1 }
  0xf2   : > { %v429_v13 = vadd.f32 %v428_v12, %v408_v11  ;;  %v448_v14 = vpop.f32.mrf.mxu2 }
  0xf4   : > { %v449_v15 = vadd.f32 %v448_v14, %v429_v13 }
  0xf5   : > { %v468_v16 = vpop.f32.mrf.mxu3 }
  0xf6   : > { %v469_v17 = vadd.f32 %v468_v16, %v449_v15 }
  0xf8   : > { %472 = vst [vmem:[%s178_s7 + $0x8] sm:$0xff] %v469_v17 }
  0xf9   : > { %734 = shalt.err (!%p731_p8)
}
  0xfa   : > { %594 = dma.vmem_to_hbm [thread:$0]  (%p856_p12), %s488_s15, 256, %s490_s18, %s474_s16  }
  0xfb PF: > { %p611_p9 = scmp.ge.s32.totalorder %s777_s12, 2  ;;  %s501_s29 = sand.u32 1, %s765_s9  }
  0xfc   : > { %s502_s4 = scalar_lea.sflag [#allocation4], %s501_s29 }
  0xfd   : > { %p605_p10 = pnand %p611_p9, %p861_p2 }
  0xff   : > { %p606_p13 = pneg %p605_p10 }
 0x101   : > { %760 = dma.done.wait (%p606_p13), %s502_s4, 256  }
 0x102   : > { %762 = vsyncadd (%p606_p13), %s502_s4, 4294967040  ;;  %p16_p0 = scmp.ge.s32.totalorder %s836_s23, 7   ;;  %s946_s9 = smov %s769_s10 }
 0x103   : > { %s947_s10 = smov %s773_s11  ;;  %s948_s11 = smov %s848_s26 }
 0x104   : > { %s949_s12 = smov %s836_s23  ;;  %18 = sbr.rel (!%p16_p0) target bundleno = 6 (0x6), region = 77 }
 0x109   :  { %508 = vsyncpa [#allocation3], 1 }
 0x10a   :  { %510 = vsyncpa [#allocation3 + $0x1], 1 }
 0x10b   :  { %511 = vsyncpa [#allocation6], 1 }
 0x10c   :  { %512 = vsyncpa [#allocation4], 1 }
 0x10d   :  { %514 = vsyncpa [#allocation4 + $0x1], 1 }

</bundles_post_ra>
